<compile_context>
chip_gen: v6e
topology: v6e:2x2x1
jax: 0.10.0
libtpu: 0.0.40
codegen_flags: <defaults>
</compile_context>

<pallas_src>
import functools

import jax
import jax.numpy as jnp
from jax.experimental import pallas as pl
from jax.experimental.pallas import tpu as pltpu

EPS = 1e-12


def _sn_conv_kernel(w2d_ref, wk_ref, u_ref, v_ref, b_ref, x_ref,
                    o_ref, u_out_ref, v_out_ref,
                    *, power_iterations, KH, KW, Wp, L):
    """Fused SpectralNorm power iteration + scaled 3x3 'same' conv.

    w2d_ref : (O, K)        f32, resident (power iteration view of w_bar)
    wk_ref  : (KH*KW, O, C) f32, resident (per-tap weights)
    u_ref   : (O, 1) f32    v_ref : (1, K) f32    b_ref : (O, 1) f32
    x_ref   : (1, C, FLAT)  bf16 lane-flattened zero-padded image
    o_ref   : (1, O, L)     f32 lane-dense output (L = H * Wp)
    u_out_ref/(O,1), v_out_ref/(1,K): updated power-iteration vectors
    """
    # ---- power iteration + 1/sigma on VPU/XLU (no near-empty MXU matmuls).
    # Recomputed every step; constant-index idempotent writes => megacore safe.
    w = w2d_ref[...]                                    # (O, K)
    u = u_ref[...]                                      # (O, 1)
    v = v_ref[...]                                      # (1, K)
    for _ in range(power_iterations):
        wtu = jnp.sum(w * u, axis=0, keepdims=True)     # (1, K)  = W^T u
        v = wtu / (jnp.sqrt(jnp.sum(wtu * wtu)) + EPS)
        wv = jnp.sum(w * v, axis=1, keepdims=True)      # (O, 1)  = W v
        u = wv / (jnp.sqrt(jnp.sum(wv * wv)) + EPS)
    wv = jnp.sum(w * v, axis=1, keepdims=True)
    sigma = jnp.sum(u * wv)
    inv_sigma = 1.0 / sigma
    u_out_ref[...] = u
    v_out_ref[...] = v

    # ---- conv as 9 shifted accumulating matmuls on the flattened image.
    # Fold 1/sigma into the tiny weight once (9*O*C mults), not per column.
    ws = (wk_ref[...] * inv_sigma).astype(jnp.bfloat16)  # (KK, O, C) bf16
    xf = x_ref[0]                                        # (C, FLAT)  bf16
    acc = None
    for kh in range(KH):
        for kw in range(KW):
            s = kh * Wp + kw                             # tap offset
            xs = xf[:, s:s + L]                          # (C, L) shifted view
            part = jnp.dot(ws[kh * KW + kw], xs,
                           preferred_element_type=jnp.float32)
            acc = part if acc is None else acc + part
    o_ref[0] = acc + b_ref[...]                          # (O, L) + (O, 1)


@functools.partial(jax.jit, static_argnames=("power_iterations",))
def spectral_norm_conv2d(x, w_bar, bias, u, v, power_iterations=1):
    """Forward of SpectralNorm(nn.Conv2d(C, O, 3, stride=1, padding=1)).

    x : (N,C,H,W) f32 NCHW, w_bar : (O,C,KH,KW) f32 OIHW, bias : (O,)
    u : (O,), v : (C*KH*KW,)  power-iteration vectors.
    Returns (out NCHW f32, u_new, v_new).
    """
    N, C, H, W = x.shape
    O, Cw, KH, KW = w_bar.shape
    assert C == Cw
    K = C * KH * KW
    KK = KH * KW
    ph, pw = KH // 2, KW // 2                     # 'same' padding (SAGAN)
    Hp, Wp = H + 2 * ph, W + 2 * pw
    L = H * Wp                                    # flattened output cols/img
    FLAT = ((Hp * Wp + (KW - 1) + 127) // 128) * 128   # lane-padded input len

    # Single cheap pad + bf16 cast + flatten pass (no 9x im2col, no transpose).
    xp = jnp.pad(x, ((0, 0), (0, 0), (ph, ph), (pw, pw))).astype(jnp.bfloat16)
    xflat = xp.reshape(N, C, Hp * Wp)
    xflat = jnp.pad(xflat, ((0, 0), (0, 0), (0, FLAT - Hp * Wp)))

    w2d = w_bar.reshape(O, K).astype(jnp.float32)                     # PI view
    wk = jnp.transpose(w_bar, (2, 3, 0, 1)).reshape(KK, O, C).astype(jnp.float32)
    u_col = u.reshape(O, 1).astype(jnp.float32)
    v_row = v.reshape(1, K).astype(jnp.float32)
    b_col = bias.reshape(O, 1).astype(jnp.float32)

    kernel = functools.partial(_sn_conv_kernel,
                               power_iterations=power_iterations,
                               KH=KH, KW=KW, Wp=Wp, L=L)

    out_flat, u_new, v_new = pl.pallas_call(
        kernel,
        out_shape=(
            jax.ShapeDtypeStruct((N, O, L), jnp.float32),
            jax.ShapeDtypeStruct((O, 1), jnp.float32),
            jax.ShapeDtypeStruct((1, K), jnp.float32),
        ),
        grid=(N,),
        in_specs=[
            pl.BlockSpec((O, K), lambda n: (0, 0)),          # w2d (resident)
            pl.BlockSpec((KK, O, C), lambda n: (0, 0, 0)),   # per-tap weights
            pl.BlockSpec((O, 1), lambda n: (0, 0)),          # u
            pl.BlockSpec((1, K), lambda n: (0, 0)),          # v
            pl.BlockSpec((O, 1), lambda n: (0, 0)),          # bias
            pl.BlockSpec((1, C, FLAT), lambda n: (n, 0, 0)), # one image / step
        ],
        out_specs=(
            pl.BlockSpec((1, O, L), lambda n: (n, 0, 0)),    # lane-dense out
            pl.BlockSpec((O, 1), lambda n: (0, 0)),          # u_new (idempotent)
            pl.BlockSpec((1, K), lambda n: (0, 0)),          # v_new (idempotent)
        ),
        compiler_params=pltpu.CompilerParams(
            dimension_semantics=("parallel",)),
    )(w2d, wk, u_col, v_row, b_col, xflat)

    # (N,O,L) -> (N,O,H,Wp) -> drop the Wp-W pad columns: already NCHW.
    out = out_flat.reshape(N, O, H, Wp)[:, :, :, :W]
    return out, u_new.reshape(O), v_new.reshape(K)


if __name__ == "__main__":
    key = jax.random.PRNGKey(0)
    kx, kwt, kb, ku, kv = jax.random.split(key, 5)

    N, C, H, W = 2, 4, 16, 16
    O, KH, KW = 8, 3, 3
    K = C * KH * KW

    x = jax.random.normal(kx, (N, C, H, W), jnp.float32)
    w_bar = jax.random.normal(kwt, (O, C, KH, KW), jnp.float32) * 0.1
    bias = jax.random.normal(kb, (O,), jnp.float32) * 0.1
    # u, v initialized like _make_params: normal(0, 1) then l2-normalized.
    u0 = jax.random.normal(ku, (O,), jnp.float32)
    v0 = jax.random.normal(kv, (K,), jnp.float32)
    u0 = u0 / (jnp.linalg.norm(u0) + EPS)
    v0 = v0 / (jnp.linalg.norm(v0) + EPS)

    out, u_new, v_new = spectral_norm_conv2d(x, w_bar, bias, u0, v0,
                                             power_iterations=1)
    jax.block_until_ready(out)

    # Pure-JAX f32 reference (same math as the PyTorch module).
    w2d = w_bar.reshape(O, -1)
    uu, vv = u0, v0
    for _ in range(1):
        vv = w2d.T @ uu
        vv = vv / (jnp.linalg.norm(vv) + EPS)
        uu = w2d @ vv
        uu = uu / (jnp.linalg.norm(uu) + EPS)
    sigma = uu @ (w2d @ vv)
    ref = jax.lax.conv_general_dilated(
        x, w_bar / sigma, window_strides=(1, 1), padding="SAME",
        dimension_numbers=("NCHW", "OIHW", "NCHW")) + bias.reshape(1, O, 1, 1)

    # Power-iteration path is f32 -> tight tolerance.
    assert jnp.allclose(u_new, uu, atol=1e-5, rtol=1e-5), "u mismatch"
    assert jnp.allclose(v_new, vv, atol=1e-5, rtol=1e-5), "v mismatch"
    # Conv path uses bf16 MXU operands with f32 accumulation -> bf16 tolerance.
    assert jnp.allclose(out, ref, atol=2e-2, rtol=2e-2), "conv mismatch vs reference"
    print("KERNEL_OK")
</pallas_src>

<mosaic_0001>
module attributes {stable_mosaic.version = 11 : i64} {
  func.func @_sn_conv_kernel(%arg0: i32, %arg1: memref<8x36xf32, #tpu.memory_space<vmem>>, %arg2: memref<9x8x4xf32, #tpu.memory_space<vmem>>, %arg3: memref<8x1xf32, #tpu.memory_space<vmem>>, %arg4: memref<1x36xf32, #tpu.memory_space<vmem>>, %arg5: memref<8x1xf32, #tpu.memory_space<vmem>>, %arg6: memref<1x4x384xbf16, #tpu.memory_space<vmem>>, %arg7: memref<1x8x288xf32, #tpu.memory_space<vmem>>, %arg8: memref<8x1xf32, #tpu.memory_space<vmem>>, %arg9: memref<1x36xf32, #tpu.memory_space<vmem>>) attributes {dimension_semantics = [#tpu.dimension_semantics<parallel>], iteration_bounds = array<i64: 2>, scalar_prefetch = 0 : i64, scratch_operands = 0 : i64, tpu.core_type = #tpu.core_type<tc>, window_params = [{pipeline_mode = #tpu.pipeline_mode<synchronous>, transform_indices = @transform_0, window_bounds = array<i64: 8, 36>}, {pipeline_mode = #tpu.pipeline_mode<synchronous>, transform_indices = @transform_1, window_bounds = array<i64: 9, 8, 4>}, {pipeline_mode = #tpu.pipeline_mode<synchronous>, transform_indices = @transform_2, window_bounds = array<i64: 8, 1>}, {pipeline_mode = #tpu.pipeline_mode<synchronous>, transform_indices = @transform_3, window_bounds = array<i64: 1, 36>}, {pipeline_mode = #tpu.pipeline_mode<synchronous>, transform_indices = @transform_4, window_bounds = array<i64: 8, 1>}, {transform_indices = @transform_5, window_bounds = array<i64: 1, 4, 384>}, {transform_indices = @transform_6, window_bounds = array<i64: 1, 8, 288>}, {pipeline_mode = #tpu.pipeline_mode<synchronous>, transform_indices = @transform_7, window_bounds = array<i64: 8, 1>}, {pipeline_mode = #tpu.pipeline_mode<synchronous>, transform_indices = @transform_8, window_bounds = array<i64: 1, 36>}]} {
    %c0 = arith.constant 0 : index
    %c0_0 = arith.constant 0 : index
    %0 = vector.load %arg1[%c0, %c0_0] : memref<8x36xf32, #tpu.memory_space<vmem>>, vector<8x36xf32>
    %c0_1 = arith.constant 0 : index
    %c0_2 = arith.constant 0 : index
    %1 = vector.load %arg3[%c0_1, %c0_2] : memref<8x1xf32, #tpu.memory_space<vmem>>, vector<8x1xf32>
    %2 = vector.broadcast %1 : vector<8x1xf32> to vector<8x36xf32>
    %3 = arith.mulf %0, %2 : vector<8x36xf32>
    %cst = arith.constant dense<0.000000e+00> : vector<36xf32>
    %4 = vector.multi_reduction <add>, %3, %cst [0] : vector<8x36xf32> to vector<36xf32>
    %5 = vector.shape_cast %4 : vector<36xf32> to vector<1x36xf32>
    %6 = arith.mulf %5, %5 : vector<1x36xf32>
    %7 = vector.shape_cast %6 : vector<1x36xf32> to vector<1x1x36xf32>
    %cst_3 = arith.constant dense<0.000000e+00> : vector<1xf32>
    %8 = vector.multi_reduction <add>, %7, %cst_3 [1, 2] : vector<1x1x36xf32> to vector<1xf32>
    %9 = vector.shape_cast %8 : vector<1xf32> to vector<1x1x1xf32>
    %10 = vector.extract %9[0, 0, 0] : f32 from vector<1x1x1xf32>
    %11 = math.sqrt %10 : f32
    %cst_4 = arith.constant 9.99999996E-13 : f32
    %12 = arith.addf %11, %cst_4 : f32
    %13 = vector.broadcast %12 : f32 to vector<1x36xf32>
    %14 = arith.divf %5, %13 : vector<1x36xf32>
    %15 = vector.broadcast %14 : vector<1x36xf32> to vector<8x36xf32>
    %16 = arith.mulf %0, %15 : vector<8x36xf32>
    %cst_5 = arith.constant dense<0.000000e+00> : vector<8xf32>
    %17 = vector.multi_reduction <add>, %16, %cst_5 [1] : vector<8x36xf32> to vector<8xf32>
    %18 = vector.shape_cast %17 : vector<8xf32> to vector<8x1xf32>
    %19 = arith.mulf %18, %18 : vector<8x1xf32>
    %20 = vector.shape_cast %19 : vector<8x1xf32> to vector<1x8x1xf32>
    %cst_6 = arith.constant dense<0.000000e+00> : vector<1xf32>
    %21 = vector.multi_reduction <add>, %20, %cst_6 [1, 2] : vector<1x8x1xf32> to vector<1xf32>
    %22 = vector.shape_cast %21 : vector<1xf32> to vector<1x1x1xf32>
    %23 = vector.extract %22[0, 0, 0] : f32 from vector<1x1x1xf32>
    %24 = math.sqrt %23 : f32
    %cst_7 = arith.constant 9.99999996E-13 : f32
    %25 = arith.addf %24, %cst_7 : f32
    %26 = vector.broadcast %25 : f32 to vector<8x1xf32>
    %27 = arith.divf %18, %26 : vector<8x1xf32>
    %28 = vector.broadcast %14 : vector<1x36xf32> to vector<8x36xf32>
    %29 = arith.mulf %0, %28 : vector<8x36xf32>
    %cst_8 = arith.constant dense<0.000000e+00> : vector<8xf32>
    %30 = vector.multi_reduction <add>, %29, %cst_8 [1] : vector<8x36xf32> to vector<8xf32>
    %31 = vector.shape_cast %30 : vector<8xf32> to vector<8x1xf32>
    %32 = arith.mulf %27, %31 : vector<8x1xf32>
    %33 = vector.shape_cast %32 : vector<8x1xf32> to vector<1x8x1xf32>
    %cst_9 = arith.constant dense<0.000000e+00> : vector<1xf32>
    %34 = vector.multi_reduction <add>, %33, %cst_9 [1, 2] : vector<1x8x1xf32> to vector<1xf32>
    %35 = vector.shape_cast %34 : vector<1xf32> to vector<1x1x1xf32>
    %36 = vector.extract %35[0, 0, 0] : f32 from vector<1x1x1xf32>
    %cst_10 = arith.constant 1.000000e+00 : f32
    %37 = arith.divf %cst_10, %36 : f32
    %c0_11 = arith.constant 0 : index
    %c0_12 = arith.constant 0 : index
    %38 = vector.load %arg8[%c0_11, %c0_12] : memref<8x1xf32, #tpu.memory_space<vmem>>, vector<8x1xf32>
    tpu.vector_store %arg8[%c0_11, %c0_12], %27 {strides = array<i32>} : memref<8x1xf32, #tpu.memory_space<vmem>>, vector<8x1xf32>,
    %c0_13 = arith.constant 0 : index
    %c0_14 = arith.constant 0 : index
    %39 = vector.load %arg9[%c0_13, %c0_14] : memref<1x36xf32, #tpu.memory_space<vmem>>, vector<1x36xf32>
    tpu.vector_store %arg9[%c0_13, %c0_14], %14 {strides = array<i32>} : memref<1x36xf32, #tpu.memory_space<vmem>>, vector<1x36xf32>,
    %c0_15 = arith.constant 0 : index
    %c0_16 = arith.constant 0 : index
    %c0_17 = arith.constant 0 : index
    %40 = vector.load %arg2[%c0_15, %c0_16, %c0_17] : memref<9x8x4xf32, #tpu.memory_space<vmem>>, vector<9x8x4xf32>
    %41 = vector.broadcast %37 : f32 to vector<9x8x4xf32>
    %42 = arith.mulf %40, %41 : vector<9x8x4xf32>
    %43 = arith.truncf %42 : vector<9x8x4xf32> to vector<9x8x4xbf16>
    %c0_18 = arith.constant 0 : index
    %c0_19 = arith.constant 0 : index
    %c0_20 = arith.constant 0 : index
    %44 = vector.load %arg6[%c0_18, %c0_19, %c0_20] : memref<1x4x384xbf16, #tpu.memory_space<vmem>>, vector<1x4x384xbf16>
    %45 = vector.shape_cast %44 : vector<1x4x384xbf16> to vector<4x384xbf16>
    %46 = vector.extract_strided_slice %45 {offsets = [0, 0], sizes = [4, 288], strides = [1, 1]} : vector<4x384xbf16> to vector<4x288xbf16>
    %47 = vector.extract_strided_slice %43 {offsets = [0, 0, 0], sizes = [1, 8, 4], strides = [1, 1, 1]} : vector<9x8x4xbf16> to vector<1x8x4xbf16>
    %48 = vector.shape_cast %47 : vector<1x8x4xbf16> to vector<8x4xbf16>
    %cst_21 = arith.constant dense<0.000000e+00> : vector<8x288xf32>
    %49 = tpu.matmul %48, %46, %cst_21 {dimension_numbers = #tpu.dot_dimension_numbers<[1], [0], [0], [1], [0, 0, 1, 1], [], []>} : vector<8x4xbf16>, vector<4x288xbf16>, vector<8x288xf32> -> vector<8x288xf32>
    %50 = vector.extract_strided_slice %45 {offsets = [0, 1], sizes = [4, 288], strides = [1, 1]} : vector<4x384xbf16> to vector<4x288xbf16>
    %51 = vector.extract_strided_slice %43 {offsets = [1, 0, 0], sizes = [1, 8, 4], strides = [1, 1, 1]} : vector<9x8x4xbf16> to vector<1x8x4xbf16>
    %52 = vector.shape_cast %51 : vector<1x8x4xbf16> to vector<8x4xbf16>
    %cst_22 = arith.constant dense<0.000000e+00> : vector<8x288xf32>
    %53 = tpu.matmul %52, %50, %cst_22 {dimension_numbers = #tpu.dot_dimension_numbers<[1], [0], [0], [1], [0, 0, 1, 1], [], []>} : vector<8x4xbf16>, vector<4x288xbf16>, vector<8x288xf32> -> vector<8x288xf32>
    %54 = arith.addf %49, %53 : vector<8x288xf32>
    %55 = vector.extract_strided_slice %45 {offsets = [0, 2], sizes = [4, 288], strides = [1, 1]} : vector<4x384xbf16> to vector<4x288xbf16>
    %56 = vector.extract_strided_slice %43 {offsets = [2, 0, 0], sizes = [1, 8, 4], strides = [1, 1, 1]} : vector<9x8x4xbf16> to vector<1x8x4xbf16>
    %57 = vector.shape_cast %56 : vector<1x8x4xbf16> to vector<8x4xbf16>
    %cst_23 = arith.constant dense<0.000000e+00> : vector<8x288xf32>
    %58 = tpu.matmul %57, %55, %cst_23 {dimension_numbers = #tpu.dot_dimension_numbers<[1], [0], [0], [1], [0, 0, 1, 1], [], []>} : vector<8x4xbf16>, vector<4x288xbf16>, vector<8x288xf32> -> vector<8x288xf32>
    %59 = arith.addf %54, %58 : vector<8x288xf32>
    %60 = vector.extract_strided_slice %45 {offsets = [0, 18], sizes = [4, 288], strides = [1, 1]} : vector<4x384xbf16> to vector<4x288xbf16>
    %61 = vector.extract_strided_slice %43 {offsets = [3, 0, 0], sizes = [1, 8, 4], strides = [1, 1, 1]} : vector<9x8x4xbf16> to vector<1x8x4xbf16>
    %62 = vector.shape_cast %61 : vector<1x8x4xbf16> to vector<8x4xbf16>
    %cst_24 = arith.constant dense<0.000000e+00> : vector<8x288xf32>
    %63 = tpu.matmul %62, %60, %cst_24 {dimension_numbers = #tpu.dot_dimension_numbers<[1], [0], [0], [1], [0, 0, 1, 1], [], []>} : vector<8x4xbf16>, vector<4x288xbf16>, vector<8x288xf32> -> vector<8x288xf32>
    %64 = arith.addf %59, %63 : vector<8x288xf32>
    %65 = vector.extract_strided_slice %45 {offsets = [0, 19], sizes = [4, 288], strides = [1, 1]} : vector<4x384xbf16> to vector<4x288xbf16>
    %66 = vector.extract_strided_slice %43 {offsets = [4, 0, 0], sizes = [1, 8, 4], strides = [1, 1, 1]} : vector<9x8x4xbf16> to vector<1x8x4xbf16>
    %67 = vector.shape_cast %66 : vector<1x8x4xbf16> to vector<8x4xbf16>
    %cst_25 = arith.constant dense<0.000000e+00> : vector<8x288xf32>
    %68 = tpu.matmul %67, %65, %cst_25 {dimension_numbers = #tpu.dot_dimension_numbers<[1], [0], [0], [1], [0, 0, 1, 1], [], []>} : vector<8x4xbf16>, vector<4x288xbf16>, vector<8x288xf32> -> vector<8x288xf32>
    %69 = arith.addf %64, %68 : vector<8x288xf32>
    %70 = vector.extract_strided_slice %45 {offsets = [0, 20], sizes = [4, 288], strides = [1, 1]} : vector<4x384xbf16> to vector<4x288xbf16>
    %71 = vector.extract_strided_slice %43 {offsets = [5, 0, 0], sizes = [1, 8, 4], strides = [1, 1, 1]} : vector<9x8x4xbf16> to vector<1x8x4xbf16>
    %72 = vector.shape_cast %71 : vector<1x8x4xbf16> to vector<8x4xbf16>
    %cst_26 = arith.constant dense<0.000000e+00> : vector<8x288xf32>
    %73 = tpu.matmul %72, %70, %cst_26 {dimension_numbers = #tpu.dot_dimension_numbers<[1], [0], [0], [1], [0, 0, 1, 1], [], []>} : vector<8x4xbf16>, vector<4x288xbf16>, vector<8x288xf32> -> vector<8x288xf32>
    %74 = arith.addf %69, %73 : vector<8x288xf32>
    %75 = vector.extract_strided_slice %45 {offsets = [0, 36], sizes = [4, 288], strides = [1, 1]} : vector<4x384xbf16> to vector<4x288xbf16>
    %76 = vector.extract_strided_slice %43 {offsets = [6, 0, 0], sizes = [1, 8, 4], strides = [1, 1, 1]} : vector<9x8x4xbf16> to vector<1x8x4xbf16>
    %77 = vector.shape_cast %76 : vector<1x8x4xbf16> to vector<8x4xbf16>
    %cst_27 = arith.constant dense<0.000000e+00> : vector<8x288xf32>
    %78 = tpu.matmul %77, %75, %cst_27 {dimension_numbers = #tpu.dot_dimension_numbers<[1], [0], [0], [1], [0, 0, 1, 1], [], []>} : vector<8x4xbf16>, vector<4x288xbf16>, vector<8x288xf32> -> vector<8x288xf32>
    %79 = arith.addf %74, %78 : vector<8x288xf32>
    %80 = vector.extract_strided_slice %45 {offsets = [0, 37], sizes = [4, 288], strides = [1, 1]} : vector<4x384xbf16> to vector<4x288xbf16>
    %81 = vector.extract_strided_slice %43 {offsets = [7, 0, 0], sizes = [1, 8, 4], strides = [1, 1, 1]} : vector<9x8x4xbf16> to vector<1x8x4xbf16>
    %82 = vector.shape_cast %81 : vector<1x8x4xbf16> to vector<8x4xbf16>
    %cst_28 = arith.constant dense<0.000000e+00> : vector<8x288xf32>
    %83 = tpu.matmul %82, %80, %cst_28 {dimension_numbers = #tpu.dot_dimension_numbers<[1], [0], [0], [1], [0, 0, 1, 1], [], []>} : vector<8x4xbf16>, vector<4x288xbf16>, vector<8x288xf32> -> vector<8x288xf32>
    %84 = arith.addf %79, %83 : vector<8x288xf32>
    %85 = vector.extract_strided_slice %45 {offsets = [0, 38], sizes = [4, 288], strides = [1, 1]} : vector<4x384xbf16> to vector<4x288xbf16>
    %86 = vector.extract_strided_slice %43 {offsets = [8, 0, 0], sizes = [1, 8, 4], strides = [1, 1, 1]} : vector<9x8x4xbf16> to vector<1x8x4xbf16>
    %87 = vector.shape_cast %86 : vector<1x8x4xbf16> to vector<8x4xbf16>
    %cst_29 = arith.constant dense<0.000000e+00> : vector<8x288xf32>
    %88 = tpu.matmul %87, %85, %cst_29 {dimension_numbers = #tpu.dot_dimension_numbers<[1], [0], [0], [1], [0, 0, 1, 1], [], []>} : vector<8x4xbf16>, vector<4x288xbf16>, vector<8x288xf32> -> vector<8x288xf32>
    %89 = arith.addf %84, %88 : vector<8x288xf32>
    %c0_30 = arith.constant 0 : index
    %c0_31 = arith.constant 0 : index
    %90 = vector.load %arg5[%c0_30, %c0_31] : memref<8x1xf32, #tpu.memory_space<vmem>>, vector<8x1xf32>
    %91 = vector.broadcast %90 : vector<8x1xf32> to vector<8x288xf32>
    %92 = arith.addf %89, %91 : vector<8x288xf32>
    %c0_32 = arith.constant 0 : index
    %c0_33 = arith.constant 0 : index
    %c0_34 = arith.constant 0 : index
    %93 = vector.load %arg7[%c0_32, %c0_33, %c0_34] : memref<1x8x288xf32, #tpu.memory_space<vmem>>, vector<1x8x288xf32>
    %94 = vector.shape_cast %93 : vector<1x8x288xf32> to vector<8x288xf32>
    %95 = vector.shape_cast %92 : vector<8x288xf32> to vector<1x8x288xf32>
    tpu.vector_store %arg7[%c0_32, %c0_33, %c0_34], %95 {strides = array<i32>} : memref<1x8x288xf32, #tpu.memory_space<vmem>>, vector<1x8x288xf32>,
    return
  }
  func.func @transform_0(%arg0: i32) -> (i32, i32) {
    %c0_i32 = arith.constant 0 : i32
    %c0_i32_0 = arith.constant 0 : i32
    %c0_i32_1 = arith.constant 0 : i32
    return %c0_i32, %c0_i32_0 : i32, i32
  }
  func.func @transform_1(%arg0: i32) -> (i32, i32, i32) {
    %c0_i32 = arith.constant 0 : i32
    %c0_i32_0 = arith.constant 0 : i32
    %c0_i32_1 = arith.constant 0 : i32
    %c0_i32_2 = arith.constant 0 : i32
    return %c0_i32, %c0_i32_0, %c0_i32_1 : i32, i32, i32
  }
  func.func @transform_2(%arg0: i32) -> (i32, i32) {
    %c0_i32 = arith.constant 0 : i32
    %c0_i32_0 = arith.constant 0 : i32
    %c0_i32_1 = arith.constant 0 : i32
    return %c0_i32, %c0_i32_0 : i32, i32
  }
  func.func @transform_3(%arg0: i32) -> (i32, i32) {
    %c0_i32 = arith.constant 0 : i32
    %c0_i32_0 = arith.constant 0 : i32
    %c0_i32_1 = arith.constant 0 : i32
    return %c0_i32, %c0_i32_0 : i32, i32
  }
  func.func @transform_4(%arg0: i32) -> (i32, i32) {
    %c0_i32 = arith.constant 0 : i32
    %c0_i32_0 = arith.constant 0 : i32
    %c0_i32_1 = arith.constant 0 : i32
    return %c0_i32, %c0_i32_0 : i32, i32
  }
  func.func @transform_5(%arg0: i32) -> (i32, i32, i32) {
    %c0_i32 = arith.constant 0 : i32
    %c0_i32_0 = arith.constant 0 : i32
    %c0_i32_1 = arith.constant 0 : i32
    return %arg0, %c0_i32, %c0_i32_0 : i32, i32, i32
  }
  func.func @transform_6(%arg0: i32) -> (i32, i32, i32) {
    %c0_i32 = arith.constant 0 : i32
    %c0_i32_0 = arith.constant 0 : i32
    %c0_i32_1 = arith.constant 0 : i32
    return %arg0, %c0_i32, %c0_i32_0 : i32, i32, i32
  }
  func.func @transform_7(%arg0: i32) -> (i32, i32) {
    %c0_i32 = arith.constant 0 : i32
    %c0_i32_0 = arith.constant 0 : i32
    %c0_i32_1 = arith.constant 0 : i32
    return %c0_i32, %c0_i32_0 : i32, i32
  }
  func.func @transform_8(%arg0: i32) -> (i32, i32) {
    %c0_i32 = arith.constant 0 : i32
    %c0_i32_0 = arith.constant 0 : i32
    %c0_i32_1 = arith.constant 0 : i32
    return %c0_i32, %c0_i32_0 : i32, i32
  }
}

</mosaic_0001>

<bundles_post_ra>
// kernel: spectral_norm_conv2d.1
= control target key start
LH: loop header
LB: loop body
LE: loop exit
PB: predicated region body
PF: predicated region fallthrough
CT: control target
= control target key end

     0   :  { %14 = vsyncpa [#allocation3], 0  ;;  %s1723_s27 = smov 0   ;;  %s1934_s0 = inlined_call_operand.vmem [shape: f32[8,36], index: 0, kind: input, shape index: {}]   ;;  %s1935_s1 = inlined_call_operand.vmem [shape: f32[9,8,4], index: 1, kind: input, shape index: {}]   ;;  %s1936_s2 = inlined_call_operand.vmem [shape: f32[8,1], index: 2, kind: input, shape index: {}]   ;;  %s1937_s3 = inlined_call_operand.vmem [shape: f32[1,36], index: 3, kind: input, shape index: {}]   ;;  %s1938_s4 = inlined_call_operand.vmem [shape: f32[8,1], index: 4, kind: input, shape index: {}]   ;;  %s1939_s5 = inlined_call_operand.vmem [shape: bf16[2,4,384], index: 5, kind: input, shape index: {}]   ;;  %s1940_s6 = inlined_call_operand.vmem [shape: f32[2,8,288], index: 6, kind: output, shape index: {0}]   ;;  %s1941_s7 = inlined_call_operand.vmem [shape: f32[8,1], index: 7, kind: output, shape index: {1}]   ;;  %s1942_s8 = inlined_call_operand.hbm [shape: f32[1,36], index: 8, kind: output, shape index: {2}]  }
   0x1 LB: > { %s1729_s3 = sadd.s32 4294967295, %s1663_s27   ;;  %p1469_p0 = scmp.ge.s32.totalorder %s1663_s27, 1  ;;  %s1663_s27 = sphi %s1723_s27, %s20_s27  }
   0x2   : > { %p258_p1 = scmp.lt.s32.totalorder %s1663_s27, 3 }
   0x4   : > { %p259_p2 = pnand %p1469_p0, %p258_p1 }
   0x5   : > { %p292_p3 = scmp.lt.s32.totalorder (!%p259_p2), %s1729_s3, 1  ;;  %s1667_s23 = smov (!%p259_p2), 126  }
   0x6   : > { %262 = sbr.rel (%p259_p2) target bundleno = 1414 (0x586), region = 44  ;;  %s1668_s24 = smov (!%p259_p2), 127  }
   0x7   : > { %s1669_s25 = smov (!%p259_p2), 109   ;;  %s1670_s26 = smov (!%p259_p2), 108  }
   0x8   : > { %s1671_s28 = smov (!%p259_p2), 92   ;;  %s1672_s29 = smov (!%p259_p2), 110  }
   0x9   : > { %s1673_s30 = smov (!%p259_p2), 91   ;;  %s1674_s9 = smov (!%p259_p2), 90  }
   0xa   : > { %p1593_p4 = scmp.eq.s32.totalorder (!%p259_p2), %s1729_s3, 1 }
   0xb   : > { %v304_v0 = vld [vmem:[%s1936_s2] sm:$0xff]  ;;  %v1665_v1 = vmov 0   ;;  %vm311_vm0 = vcmask 293888   ;;  %vm320_vm1 = vcmask 286720   ;;  %vm349_vm4 = vcmask 7168   ;;  %s1754_s18 = scalar_select %p292_p3, %s1729_s3, 1 }
   0xc   : > { %1616 = vset.pattern.permute.xlu0 %v1665_v1  ;;  %490 = vmatprep.mubr.bf16.mxu0 %v1665_v1  ;;  %v303_v2 = vld [vmem:[%s1934_s0] sm:$0xff]  ;;  %v1666_v53 = vmov 1983009808   ;;  %v423_v55 = vlaneseq  ;;  %vm1676_vm7 = vmmov 0   ;;  %vm441_vm8 = vcmask 1039360  }
   0xd   : > { %307 = vperm.xlu0 %1616, %v304_v0   ;;  %1617 = vset.pattern.permute.xlu1 %v1665_v1  ;;  %v421_v54 = vunpack.c.l.s4 %v1666_v53  ;;  %s1575_s19 = smul.u32 6, %s1754_s18  ;;  %vm448_vm9 = vcmask 1041408   ;;  %vm638_vm10 = vcmask 1031168   ;;  %vm444_vm11 = vcmask 31744  }
   0xe   : > { %v424_v57 = vshrl.u32 %v423_v55, 7  ;;  %vm743_vm12 = vcmask 900096   ;;  %vm848_vm13 = vcmask 891904   ;;  %vm953_vm14 = vcmask 883712  }
   0xf   : > { %v422_v56 = vunpack.c.0.s8 %v421_v54  ;;  %s296_s22 = scalar_lea.vmem %s1939_s5, %s1575_s19  ;;  %vm1058_vm15 = vcmask 752640  }
  0x10   : > { %v417_v59 = vld [vmem:[%s296_s22] sm:$0x3f] }
  0x11   : > { %v425_v58 = vsub.s32 %v422_v56, %v424_v57  ;;  %v419_v62 = vcombine.high %v417_v59, %v417_v59 }
  0x13   : > { %v1760_v60 = vrot.slane %v417_v59, %v425_v58  ;;  %v1766_v63 = vrot.slane %v419_v62, %v425_v58  ;;  %v393_v58 = vld [vmem:[%s1935_s1 + $0x20] sm:$0xff] }
  0x15   : > { %v434_v61 = vcombine.high %v1760_v60, %v1760_v60 }
  0x88   : > { %v308_v3 = vpop.permute.xlu0 %307 }
  0x89   : > { %v310_v4 = vmul.f32 %v308_v3, %v303_v2 }
  0x8b   : > { %v312_v5 = vsel %vm311_vm0, %v310_v4, 0.0 }
  0x8c   : > { %v313_v6 = vrot.slane %v312_v5, 4 }
  0x8e   : > { %v314_v7 = vadd.f32 %v313_v6, %v312_v5 }
  0x90   : > { %v315_v8 = vrot.slane %v314_v7, 2 }
  0x92   : > { %v316_v9 = vadd.f32 %v315_v8, %v314_v7 }
  0x94   : > { %v317_v10 = vrot.slane %v316_v9, 1 }
  0x96   : > { %v318_v11 = vadd.f32 %v317_v10, %v316_v9 }
  0x98   : > { %v319_v12 = vmul.f32 %v318_v11, %v318_v11 }
  0x9a   : > { %v321_v13 = vsel %vm320_vm1, %v319_v12, 0.0 }
  0x9b   : > { %322 = vadd.xlane.f32.xlu0 %v321_v13 }
  0xb1   : > { %632 = vrot.lane.b32.xlu0 %v1760_v60, %s1667_s23 }
  0xb5   : > { %842 = vrot.lane.b32.xlu0 %v1760_v60, %s1669_s25 }
  0xb9   : > { %846 = vrot.lane.b32.xlu0 %v1766_v63, %s1669_s25 }
  0xbd   : > { %949 = vrot.lane.b32.xlu0 %v434_v61, %s1670_s26 }
  0xc1   : > { %1052 = vrot.lane.b32.xlu0 %v1760_v60, %s1671_s28 }
  0xc5   : > { %1056 = vrot.lane.b32.xlu0 %v1766_v63, %s1671_s28 }
  0xc9   : > { %1159 = vrot.lane.b32.xlu0 %v434_v61, %s1673_s30 }
  0xcd   : > { %1262 = vrot.lane.b32.xlu0 %v1760_v60, %s1674_s9 }
  0xd1   : > { %1266 = vrot.lane.b32.xlu0 %v1766_v63, %s1674_s9 }
 0x124   : > { %v323_v14 = vpop.xlane.xlu0 %322 }
 0x125   : > { %v324_v15 = vrot.slane %v323_v14, 4 }
 0x127   : > { %v325_v16 = vadd.f32 %v324_v15, %v323_v14 }
 0x129   : > { %v326_v17 = vrot.slane %v325_v16, 2 }
 0x12b   : > { %v327_v18 = vadd.f32 %v326_v17, %v325_v16  ;;  %v1367_v17 = vld [vmem:[%s1938_s4] sm:$0xff] }
 0x12d   : > { %v328_v19 = vrot.slane %v327_v18, 1 }
 0x12f   : > { %v329_v20 = vadd.f32 %v328_v19, %v327_v18 }
 0x131   : > { %1577 = vpush %v329_v20 }
 0x162   : > { %s1578_s10 = spop %1577 }
 0x163   : > { %v331_v21 = vstv %s1578_s10 }
 0x164   : > { %1619 = vrsqrt.f32 %v331_v21  ;;  %vm334_vm2 = vcmp.eq.f32.partialorder %v331_v21, inf  ;;  %v337_v24 = vand.u32 2147483648, %v331_v21  ;;  %vm336_vm3 = vcmp.eq.f32.partialorder %v331_v21, 0.0 }
 0x171   : > { %v1620_v22 = vpop.eup %1619 }
 0x172   : > { %v333_v23 = vmul.f32 %v1620_v22, %v331_v21  ;;  %v390_v22 = vld [vmem:[%s1935_s1 + $0x8] sm:$0xff] }
 0x174   : > { %v335_v25 = vsel %vm334_vm2, %v331_v21, %v333_v23 }
 0x175   : > { %v338_v26 = vsel %vm336_vm3, %v337_v24, %v335_v25 }
 0x176   : > { %1579 = vpush %v338_v26  ;;  %v543_v26 = vsel %vm448_vm9, %v1760_v60, 0 }
 0x1a7   : > { %s1580_s11 = spop %1579 }
 0x1a8   : > { %s340_s12 = sadd.f32 1e-12, %s1580_s11 }
 0x1aa   : > { %v341_v27 = vstv %s340_s12  ;;  %s1677_s12 = smov [#allocation2]  }
 0x1ab   : > { %1621 = vrcp.f32 %v341_v27  ;;  %v549_v27 = vsel %vm448_vm9, %v1766_v63, 0 }
 0x1b8   : > { %v1622_v28 = vpop.eup %1621 }
 0x1b9   : > { %v343_v29 = vmul.f32 %v1622_v28, %v318_v11 }
 0x1bb   : > { %v344_v30 = vmul.f32 %v343_v29, %v303_v2  ;;  %388 = vst.msk [vmem:[#allocation2] sm:$0x1] %vm320_vm1, %v343_v29  ;;  %v1675_v2 = vmov 0.0   ;;  %vm1268_vm1 = vcmask 736256  }
 0x1bc   : > { %1521 = vmatprep.subr.bf16.mxu1 %v1675_v2  ;;  %1523 = vmatprep.mubr.msk.bf16.mxu1 %vm1676_vm7, %v1675_v2 }
 0x1bd   : > { %v345_v31 = vsel %vm311_vm0, %v344_v30, 0.0  ;;  %v389_v30 = vld [vmem:[%s1935_s1] sm:$0xff]  ;;  %vm1163_vm0 = vcmask 744448  }
 0x1be   : > { %346 = vadd.xlane.f32.xlu1 %v345_v31  ;;  %v633_v31 = vpop.permute.xlu0 %632 }
 0x247   : > { %v347_v32 = vpop.xlane.xlu1 %346 }
 0x248   : > { %v348_v33 = vmul.f32 %v347_v32, %v347_v32 }
 0x24a   : > { %v350_v34 = vsel %vm349_vm4, %v348_v33, 0.0 }
 0x24b   : > { %351 = vadd.xlane.f32.xlu1 %v350_v34 }
 0x2d4   : > { %v352_v35 = vpop.xlane.xlu1 %351 }
 0x2d5   : > { %v353_v36 = vrot.slane %v352_v35, 4 }
 0x2d7   : > { %v354_v37 = vadd.f32 %v353_v36, %v352_v35 }
 0x2d9   : > { %v355_v38 = vrot.slane %v354_v37, 2 }
 0x2db   : > { %v356_v39 = vadd.f32 %v355_v38, %v354_v37  ;;  %v391_v38 = vld [vmem:[%s1935_s1 + $0x10] sm:$0xff] }
 0x2dd   : > { %v357_v40 = vrot.slane %v356_v39, 1 }
 0x2df   : > { %v358_v41 = vadd.f32 %v357_v40, %v356_v39  ;;  %v843_v39 = vpop.permute.xlu0 %842 }
 0x2e1   : > { %1581 = vpush %v358_v41 }
 0x312   : > { %s1582_s13 = spop %1581 }
 0x313   : > { %v360_v42 = vstv %s1582_s13  ;;  %s1398_s13 = sshll.u32 %s1677_s12, 4  ;;  %s1399_s13 = int_to_ptr.vmem [resolvable:$true] %s1398_s13 }
 0x314   : > { %1623 = vrsqrt.f32 %v360_v42  ;;  %vm363_vm5 = vcmp.eq.f32.partialorder %v360_v42, inf  ;;  %v366_v45 = vand.u32 2147483648, %v360_v42  ;;  %vm365_vm6 = vcmp.eq.f32.partialorder %v360_v42, 0.0  ;;  %p1636_p8 = scmp.lt.s32.totalorder %s1399_s13, %s1399_s13 }
 0x321   : > { %v1624_v43 = vpop.eup %1623 }
 0x322   : > { %v362_v44 = vmul.f32 %v1624_v43, %v360_v42 }
 0x324   : > { %v364_v46 = vsel %vm363_vm5, %v360_v42, %v362_v44  ;;  %v847_v44 = vpop.permute.xlu0 %846 }
 0x325   : > { %v367_v47 = vsel %vm365_vm6, %v366_v45, %v364_v46  ;;  %v861_v56 = vsel %vm448_vm9, %v847_v44, 0 }
 0x326   : > { %1583 = vpush %v367_v47  ;;  %v392_v47 = vld [vmem:[%s1935_s1 + $0x18] sm:$0xff] }
 0x357   : > { %s1584_s14 = spop %1583 }
 0x358   : > { %s369_s15 = sadd.f32 1e-12, %s1584_s14  ;;  %s1629_s14 = scalar_lea.vmem %s1399_s13, 16 }
 0x359   : > { %p1630_p5 = scmp.ne.s32.totalorder %s1399_s13, %s1629_s14 }
 0x35a   : > { %v370_v48 = vstv %s369_s15 }
 0x35b   : > { %1625 = vrcp.f32 %v370_v48  ;;  %p1631_p6 = pnand %p1630_p5, %p1593_p4 }
 0x35d   : > { %p1632_p7 = pneg %p1631_p6 }
 0x368   : > { %v1626_v49 = vpop.eup %1625 }
 0x369   : > { %v372_v50 = vmul.f32 %v1626_v49, %v347_v32 }
 0x36b   : > { %v373_v51 = vmul.f32 %v372_v50, %v347_v32  ;;  %387 = vst.msk [vmem:[%s1941_s7] sm:$0xff] %vm349_vm4, %v372_v50 }
 0x36d   : > { %v374_v52 = vsel %vm349_vm4, %v373_v51, 0.0  ;;  %v950_v51 = vpop.permute.xlu0 %949 }
 0x36e   : > { %375 = vadd.xlane.f32.xlu1 %v374_v52 }
 0x371   : > { %v1053_v59 = vpop.permute.xlu0 %1052 }
 0x37f   : > { %435 = vrot.lane.b32.xlu1 %v1760_v60, %s1668_s24 }
 0x383   : > { %437 = vrot.lane.b32.xlu1 %v434_v61, %s1668_s24 }
 0x387   : > { %439 = vrot.lane.b32.xlu1 %v1766_v63, %s1668_s24 }
 0x38b   : > { %634 = vrot.lane.b32.xlu1 %v434_v61, %s1667_s23 }
 0x38f   : > { %636 = vrot.lane.b32.xlu1 %v1766_v63, %s1667_s23 }
 0x393   : > { %737 = vrot.lane.b32.xlu1 %v1760_v60, %s1672_s29 }
 0x397   : > { %739 = vrot.lane.b32.xlu1 %v434_v61, %s1672_s29 }
 0x39b   : > { %741 = vrot.lane.b32.xlu1 %v1766_v63, %s1672_s29 }
 0x39f   : > { %844 = vrot.lane.b32.xlu1 %v434_v61, %s1669_s25 }
 0x3a3   : > { %947 = vrot.lane.b32.xlu1 %v1760_v60, %s1670_s26 }
 0x3a7   : > { %951 = vrot.lane.b32.xlu1 %v1766_v63, %s1670_s26 }
 0x3ab   : > { %1054 = vrot.lane.b32.xlu1 %v434_v61, %s1671_s28 }
 0x3af   : > { %1157 = vrot.lane.b32.xlu1 %v1760_v60, %s1673_s30 }
 0x3b3   : > { %1161 = vrot.lane.b32.xlu1 %v1766_v63, %s1673_s30 }
 0x3b7   : > { %1264 = vrot.lane.b32.xlu1 %v434_v61, %s1674_s9 }
 0x3bb   : > { %1370 = vperm.xlu1 %1617, %v1367_v17  }
 0x3f7   : > { %v376_v0 = vpop.xlane.xlu1 %375 }
 0x3f8   : > { %v377_v3 = vrot.slane %v376_v0, 4 }
 0x3fa   : > { %v378_v4 = vadd.f32 %v377_v3, %v376_v0  ;;  %v1057_v0 = vpop.permute.xlu0 %1056 }
 0x3fb   : > { %v436_v5 = vpop.permute.xlu1 %435 }
 0x3fc   : > { %v379_v6 = vrot.slane %v378_v4, 2 }
 0x3fe   : > { %v380_v7 = vadd.f32 %v379_v6, %v378_v4  ;;  %v394_v6 = vld [vmem:[%s1935_s1 + $0x28] sm:$0xff] }
 0x3ff   : > { %v438_v8 = vpop.permute.xlu1 %437 }
 0x400   : > { %v381_v9 = vrot.slane %v380_v7, 1  ;;  %v442_v10 = vsel %vm441_vm8, %v436_v5, %v438_v8 }
 0x401   : > { %v450_v13 = vsel %vm448_vm9, %v442_v10, 0 }
 0x402   : > { %v382_v11 = vadd.f32 %v381_v9, %v380_v7  ;;  %v1160_v9 = vpop.permute.xlu0 %1159 }
 0x403   : > { %v440_v12 = vpop.permute.xlu1 %439 }
 0x404   : > { %1585 = vpush %v382_v11  ;;  %v443_v14 = vsel %vm441_vm8, %v438_v8, %v440_v12  ;;  %v456_v15 = vsel %vm448_vm9, %v440_v12, 0 }
 0x405   : > { %1472 = vmatprep.subr.msk.bf16.mxu0 %vm448_vm9, %v443_v14  ;;  %1522 = vmatpush3.bf16.msra.mxu1 %v456_v15  ;;  %v1071_v14 = vsel %vm448_vm9, %v1057_v0, 0 }
 0x406   : > { %473 = vmatpush1.bf16.msra.mxu0 %v450_v13  ;;  %1527 = vmatprep.subr.bf16.mxu1 %v1675_v2  ;;  %v1263_v17 = vpop.permute.xlu0 %1262 }
 0x407   : > { %1475 = vmatprep.subr.msk.bf16.mxu0 %vm448_vm9, %v434_v61  ;;  %v635_v19 = vpop.permute.xlu1 %634 }
 0x408   : > { %v639_v34 = vsel %vm638_vm10, %v633_v31, %v635_v19 }
 0x409   : > { %v645_v40 = vsel %vm448_vm9, %v639_v34, 0  ;;  %v397_v34 = vld [vmem:[%s1935_s1 + $0x40] sm:$0xff] }
 0x40b   : > { %v637_v20 = vpop.permute.xlu1 %636 }
 0x40c   : > { %v640_v29 = vsel %vm638_vm10, %v635_v19, %v637_v20  ;;  %v651_v35 = vsel %vm448_vm9, %v637_v20, 0 }
 0x40f   : > { %v738_v21 = vpop.permute.xlu1 %737 }
 0x413   : > { %v740_v28 = vpop.permute.xlu1 %739 }
 0x414   : > { %v744_v43 = vsel %vm743_vm12, %v738_v21, %v740_v28 }
 0x415   : > { %v750_v49 = vsel %vm448_vm9, %v744_v43, 0 }
 0x417   : > { %v742_v33 = vpop.permute.xlu1 %741 }
 0x418   : > { %v745_v37 = vsel %vm743_vm12, %v740_v28, %v742_v33  ;;  %v756_v45 = vsel %vm448_vm9, %v742_v33, 0 }
 0x41b   : > { %v845_v41 = vpop.permute.xlu1 %844 }
 0x41c   : > { %v850_v50 = vsel %vm848_vm13, %v845_v41, %v847_v44  ;;  %v849_v53 = vsel %vm848_vm13, %v843_v39, %v845_v41 }
 0x41d   : > { %v855_v55 = vsel %vm448_vm9, %v849_v53, 0 }
 0x41f   : > { %v948_v48 = vpop.permute.xlu1 %947 }
 0x420   : > { %v954_v63 = vsel %vm953_vm14, %v948_v48, %v950_v51 }
 0x421   : > { %v960_v3 = vsel %vm448_vm9, %v954_v63, 0 }
 0x423   : > { %v952_v54 = vpop.permute.xlu1 %951 }
 0x424   : > { %v955_v60 = vsel %vm953_vm14, %v950_v51, %v952_v54  ;;  %v966_v4 = vsel %vm448_vm9, %v952_v54, 0 }
 0x427   : > { %v1055_v61 = vpop.permute.xlu1 %1054 }
 0x428   : > { %v1060_v8 = vsel %vm1058_vm15, %v1055_v61, %v1057_v0  ;;  %v1059_v11 = vsel %vm1058_vm15, %v1053_v59, %v1055_v61 }
 0x429   : > { %v1065_v13 = vsel %vm448_vm9, %v1059_v11, 0 }
 0x42b   : > { %v1158_v7 = vpop.permute.xlu1 %1157 }
 0x42c   : > { %v1164_v20 = vsel %vm1163_vm0, %v1158_v7, %v1160_v9 }
 0x42f   : > { %v1162_v12 = vpop.permute.xlu1 %1161 }
 0x433   : > { %v1265_v21 = vpop.permute.xlu1 %1264 }
 0x435   : > { %s1586_s10 = spop %1585 }
 0x436   : > { %v384_v16 = vstv %s1586_s10 }
 0x437   : > { %1627 = vrcp.f32 %v384_v16  ;;  %v395_v16 = vld [vmem:[%s1935_s1 + $0x30] sm:$0xff] }
 0x444   : > { %v1628_v18 = vpop.eup %1627 }
 0x445   : > { %1587 = vpush %v1628_v18  ;;  %v1165_v18 = vsel %vm1163_vm0, %v1160_v9, %v1162_v12 }
 0x476   : > { %s1588_s15 = spop %1587 }
 0x477   : > { %v1796_v23 = vstv %s1588_s15  ;;  %s1635_s15 = scalar_lea.vmem %s1399_s13, 32 }
 0x478   : > { %v400_v24 = vmul.f32 %v1796_v23, %v390_v22  ;;  %v399_v32 = vmul.f32 %v1796_v23, %v389_v30  ;;  %v401_v42 = vmul.f32 %v1796_v23, %v391_v38  ;;  %v402_v52 = vmul.f32 %v1796_v23, %v392_v47  ;;  %v1267_v22 = vpop.permute.xlu0 %1266  ;;  %p1637_p9 = scmp.lt.s32.totalorder %s1635_s15, %s1629_s14 }
 0x479   : > { %v403_v62 = vmul.f32 %v1796_v23, %v393_v58  ;;  %v404_v10 = vmul.f32 %v1796_v23, %v394_v6  ;;  %v405_v19 = vmul.f32 %v1796_v23, %v395_v16  ;;  %v1270_v28 = vsel %vm1268_vm1, %v1265_v21, %v1267_v22 }
 0x47a   : > { %v409_v25 = vpack.c.bf16 %v400_v24, %v400_v24  ;;  %v408_v36 = vpack.c.bf16 %v399_v32, %v399_v32  ;;  %v410_v46 = vpack.c.bf16 %v401_v42, %v401_v42  ;;  %v411_v57 = vpack.c.bf16 %v402_v52, %v402_v52  ;;  %p1638_p10 = por %p1637_p9, %p1636_p8 }
 0x47b   : > { %v412_v5 = vpack.c.bf16 %v403_v62, %v403_v62  ;;  %v413_v15 = vpack.c.bf16 %v404_v10, %v404_v10  ;;  %v1170_v24 = vsel %vm448_vm9, %v1164_v20, 0  ;;  %v1269_v30 = vsel %vm1268_vm1, %v1263_v17, %v1265_v21 }
 0x47c   : > { %1473 = vmatmul.mubr.msk.bf16.vlgmr.msra.gmra.mxu0 %vm444_vm11, %v409_v25  ;;  %1524 = vmatmul.mubr.msk.bf16.vlgmr.msra.gmra.mxu1 %vm444_vm11, %v409_v25  ;;  %v1176_v25 = vsel %vm448_vm9, %v1162_v12, 0  ;;  %v1275_v31 = vsel %vm448_vm9, %v1269_v30, 0  ;;  %v1281_v32 = vsel %vm448_vm9, %v1267_v22, 0  ;;  %p1639_p11 = pnand %p1638_p10, %p1632_p7 }
 0x47d   : > { %566 = vmatpush1.bf16.msra.mxu0 %v543_v26  ;;  %1528 = vmatpush3.bf16.msra.mxu1 %v549_v27  ;;  %v414_v26 = vpack.c.bf16 %v405_v19, %v405_v19  ;;  %v396_v27 = vld [vmem:[%s1935_s1 + $0x38] sm:$0xff] }
 0x47e   : > { %1478 = vmatprep.subr.msk.bf16.mxu0 %vm448_vm9, %v640_v29  ;;  %583 = vmatprep.mubr.bf16.mxu0 %v1665_v1  ;;  %v406_v29 = vmul.f32 %v1796_v23, %v396_v27 }
 0x47f   : > { %1529 = vmatprep.mubr.msk.bf16.mxu1 %vm1676_vm7, %v1675_v2  ;;  %1533 = vmatprep.subr.bf16.mxu1 %v1675_v2 }
 0x480   : > { %v415_v33 = vpack.c.bf16 %v406_v29, %v406_v29 }
 0x484   : > { %1476 = vmatmul.mubr.msk.bf16.vlgmr.msra.gmra.mxu0 %vm444_vm11, %v408_v36  ;;  %1530 = vmatmul.mubr.msk.bf16.vlgmr.msra.gmra.mxu1 %vm444_vm11, %v408_v36 }
 0x485   : > { %668 = vmatpush1.bf16.msra.mxu0 %v645_v40  ;;  %1534 = vmatpush3.bf16.msra.mxu1 %v651_v35  ;;  %v407_v35 = vmul.f32 %v1796_v23, %v397_v34 }
 0x486   : > { %1481 = vmatprep.subr.msk.bf16.mxu0 %vm448_vm9, %v745_v37  ;;  %685 = vmatprep.mubr.bf16.mxu0 %v1665_v1 }
 0x487   : > { %1535 = vmatprep.mubr.msk.bf16.mxu1 %vm1676_vm7, %v1675_v2  ;;  %1539 = vmatprep.subr.bf16.mxu1 %v1675_v2  ;;  %v416_v36 = vpack.c.bf16 %v407_v35, %v407_v35 }
 0x48c   : > { %1479 = vmatmul.mubr.msk.bf16.vlgmr.msra.gmra.mxu0 %vm444_vm11, %v410_v46  ;;  %1536 = vmatmul.mubr.msk.bf16.vlgmr.msra.gmra.mxu1 %vm444_vm11, %v410_v46 }
 0x48d   : > { %773 = vmatpush1.bf16.msra.mxu0 %v750_v49  ;;  %1540 = vmatpush3.bf16.msra.mxu1 %v756_v45 }
 0x48e   : > { %790 = vmatprep.mubr.bf16.mxu0 %v1665_v1  ;;  %1541 = vmatprep.mubr.msk.bf16.mxu1 %vm1676_vm7, %v1675_v2 }
 0x48f   : > { %1484 = vmatprep.subr.msk.bf16.mxu0 %vm448_vm9, %v850_v50  ;;  %1545 = vmatprep.subr.bf16.mxu1 %v1675_v2 }
 0x494   : > { %1482 = vmatmul.mubr.msk.bf16.vlgmr.msra.gmra.mxu0 %vm444_vm11, %v411_v57  ;;  %1542 = vmatmul.mubr.msk.bf16.vlgmr.msra.gmra.mxu1 %vm444_vm11, %v411_v57 }
 0x495   : > { %878 = vmatpush1.bf16.msra.mxu0 %v855_v55  ;;  %1546 = vmatpush3.bf16.msra.mxu1 %v861_v56 }
 0x496   : > { %895 = vmatprep.mubr.bf16.mxu0 %v1665_v1  ;;  %1547 = vmatprep.mubr.msk.bf16.mxu1 %vm1676_vm7, %v1675_v2 }
 0x497   : > { %1487 = vmatprep.subr.msk.bf16.mxu0 %vm448_vm9, %v955_v60  ;;  %1551 = vmatprep.subr.bf16.mxu1 %v1675_v2 }
 0x49c   : > { %1485 = vmatmul.mubr.msk.bf16.vlgmr.msra.gmra.mxu0 %vm444_vm11, %v412_v5  ;;  %1548 = vmatmul.mubr.msk.bf16.vlgmr.msra.gmra.mxu1 %vm444_vm11, %v412_v5 }
 0x49d   : > { %983 = vmatpush1.bf16.msra.mxu0 %v960_v3  ;;  %1552 = vmatpush3.bf16.msra.mxu1 %v966_v4 }
 0x49e   : > { %1000 = vmatprep.mubr.bf16.mxu0 %v1665_v1  ;;  %1553 = vmatprep.mubr.msk.bf16.mxu1 %vm1676_vm7, %v1675_v2 }
 0x49f   : > { %1490 = vmatprep.subr.msk.bf16.mxu0 %vm448_vm9, %v1060_v8  ;;  %1557 = vmatprep.subr.bf16.mxu1 %v1675_v2 }
 0x4a4   : > { %1488 = vmatmul.mubr.msk.bf16.vlgmr.msra.gmra.mxu0 %vm444_vm11, %v413_v15  ;;  %1554 = vmatmul.mubr.msk.bf16.vlgmr.msra.gmra.mxu1 %vm444_vm11, %v413_v15 }
 0x4a5   : > { %1088 = vmatpush1.bf16.msra.mxu0 %v1065_v13  ;;  %1558 = vmatpush3.bf16.msra.mxu1 %v1071_v14 }
 0x4a6   : > { %1105 = vmatprep.mubr.bf16.mxu0 %v1665_v1  ;;  %1559 = vmatprep.mubr.msk.bf16.mxu1 %vm1676_vm7, %v1675_v2 }
 0x4a7   : > { %1493 = vmatprep.subr.msk.bf16.mxu0 %vm448_vm9, %v1165_v18  ;;  %1563 = vmatprep.subr.bf16.mxu1 %v1675_v2 }
 0x4ac   : > { %1491 = vmatmul.mubr.msk.bf16.vlgmr.msra.gmra.mxu0 %vm444_vm11, %v414_v26  ;;  %1560 = vmatmul.mubr.msk.bf16.vlgmr.msra.gmra.mxu1 %vm444_vm11, %v414_v26 }
 0x4ad   : > { %1193 = vmatpush1.bf16.msra.mxu0 %v1170_v24  ;;  %1564 = vmatpush3.bf16.msra.mxu1 %v1176_v25 }
 0x4ae   : > { %1210 = vmatprep.mubr.bf16.mxu0 %v1665_v1  ;;  %1565 = vmatprep.mubr.msk.bf16.mxu1 %vm1676_vm7, %v1675_v2 }
 0x4af   : > { %1496 = vmatprep.subr.msk.bf16.mxu0 %vm448_vm9, %v1270_v28  ;;  %1569 = vmatprep.subr.bf16.mxu1 %v1675_v2 }
 0x4b4   : > { %1494 = vmatmul.mubr.msk.bf16.vlgmr.msra.gmra.mxu0 %vm444_vm11, %v415_v33  ;;  %1566 = vmatmul.mubr.msk.bf16.vlgmr.msra.gmra.mxu1 %vm444_vm11, %v415_v33 }
 0x4b5   : > { %1298 = vmatpush1.bf16.msra.mxu0 %v1275_v31  ;;  %1570 = vmatpush3.bf16.msra.mxu1 %v1281_v32 }
 0x4b6   : > { %1315 = vmatprep.mubr.bf16.mxu0 %v1665_v1  ;;  %1571 = vmatprep.mubr.msk.bf16.mxu1 %vm1676_vm7, %v1675_v2 }
 0x4bc   : > { %1497 = vmatmul.mubr.msk.bf16.vlgmr.msra.gmra.mxu0 %vm444_vm11, %v416_v36  ;;  %1572 = vmatmul.mubr.msk.bf16.vlgmr.msra.gmra.mxu1 %vm444_vm11, %v416_v36 }
 0x4bd   : > { %1642 = shalt.err (!%p1639_p11)
}
 0x4be   : > { %1590 = dma.vmem_to_hbm [thread:$0]  (%p1593_p4), %s1399_s13, 16, %s1942_s8, [#allocation3]   ;;  %vm1378_vm2 = vcmask 261120  }
 0x4bf   : > { %s1576_s19 = smul.u32 24, %s1754_s18 }
 0x4c1   : > { %s301_s22 = scalar_lea.vmem %s1940_s6, %s1576_s19 }
 0x53c   : > { %v492_v1 = vpop.f32.mrf.mxu0  ;;  %v533_v2 = vpop.f32.mrf.mxu1 }
 0x53e   : > { %v494_v23 = vpop.f32.mrf.mxu0  ;;  %v1525_v37 = vpop.f32.mrf.mxu1 }
 0x540   : > { %v496_v38 = vpop.f32.mrf.mxu0  ;;  %v536_v39 = vpop.f32.mrf.mxu1 }
 0x542   : > { %v497_v40 = vpop.f32.mrf.mxu0  ;;  %v1526_v41 = vpop.f32.mrf.mxu1 }
 0x544   : > { %v585_v42 = vpop.f32.mrf.mxu0  ;;  %v626_v43 = vpop.f32.mrf.mxu1 }
 0x545   : > { %v586_v25 = vadd.f32 %v585_v42, %v492_v1  ;;  %v627_v26 = vadd.f32 %v626_v43, %v533_v2 }
 0x546   : > { %v587_v44 = vpop.f32.mrf.mxu0  ;;  %v1531_v45 = vpop.f32.mrf.mxu1 }
 0x547   : > { %v588_v29 = vadd.f32 %v587_v44, %v494_v23 }
 0x548   : > { %v589_v46 = vpop.f32.mrf.mxu0  ;;  %v629_v47 = vpop.f32.mrf.mxu1 }
 0x54a   : > { %v590_v48 = vpop.f32.mrf.mxu0  ;;  %v1532_v49 = vpop.f32.mrf.mxu1 }
 0x54c   : > { %v687_v50 = vpop.f32.mrf.mxu0  ;;  %v728_v51 = vpop.f32.mrf.mxu1 }
 0x54d   : > { %v734_v30 = vadd.f32 %v687_v50, %v586_v25  ;;  %v736_v31 = vadd.f32 %v728_v51, %v627_v26 }
 0x54e   : > { %v689_v52 = vpop.f32.mrf.mxu0  ;;  %v1537_v53 = vpop.f32.mrf.mxu1 }
 0x54f   : > { %v735_v34 = vadd.f32 %v689_v52, %v588_v29 }
 0x550   : > { %v691_v54 = vpop.f32.mrf.mxu0  ;;  %v731_v55 = vpop.f32.mrf.mxu1 }
 0x551   : > { %v1371_v54 = vpop.permute.xlu1 %1370 }
 0x552   : > { %v692_v56 = vpop.f32.mrf.mxu0  ;;  %v1538_v57 = vpop.f32.mrf.mxu1 }
 0x554   : > { %v792_v58 = vpop.f32.mrf.mxu0  ;;  %v833_v59 = vpop.f32.mrf.mxu1 }
 0x555   : > { %v839_v35 = vadd.f32 %v792_v58, %v734_v30  ;;  %v841_v36 = vadd.f32 %v833_v59, %v736_v31 }
 0x556   : > { %v794_v60 = vpop.f32.mrf.mxu0  ;;  %v1543_v61 = vpop.f32.mrf.mxu1 }
 0x557   : > { %v840_v39 = vadd.f32 %v794_v60, %v735_v34 }
 0x558   : > { %v796_v62 = vpop.f32.mrf.mxu0  ;;  %v836_v63 = vpop.f32.mrf.mxu1 }
 0x55a   : > { %v797_v0 = vpop.f32.mrf.mxu0  ;;  %v1544_v3 = vpop.f32.mrf.mxu1 }
 0x55c   : > { %v897_v4 = vpop.f32.mrf.mxu0  ;;  %v938_v5 = vpop.f32.mrf.mxu1 }
 0x55d   : > { %v944_v40 = vadd.f32 %v897_v4, %v839_v35  ;;  %v946_v41 = vadd.f32 %v938_v5, %v841_v36 }
 0x55e   : > { %v899_v6 = vpop.f32.mrf.mxu0  ;;  %v1549_v7 = vpop.f32.mrf.mxu1 }
 0x55f   : > { %v945_v1 = vadd.f32 %v899_v6, %v840_v39 }
 0x560   : > { %v901_v8 = vpop.f32.mrf.mxu0  ;;  %v941_v9 = vpop.f32.mrf.mxu1 }
 0x562   : > { %v902_v10 = vpop.f32.mrf.mxu0  ;;  %v1550_v11 = vpop.f32.mrf.mxu1 }
 0x564   : > { %v1002_v12 = vpop.f32.mrf.mxu0  ;;  %v1043_v13 = vpop.f32.mrf.mxu1 }
 0x565   : > { %v1049_v2 = vadd.f32 %v1002_v12, %v944_v40  ;;  %v1051_v42 = vadd.f32 %v1043_v13, %v946_v41 }
 0x566   : > { %v1004_v14 = vpop.f32.mrf.mxu0  ;;  %v1555_v15 = vpop.f32.mrf.mxu1 }
 0x567   : > { %v1050_v44 = vadd.f32 %v1004_v14, %v945_v1 }
 0x568   : > { %v1006_v16 = vpop.f32.mrf.mxu0  ;;  %v1046_v17 = vpop.f32.mrf.mxu1 }
 0x56a   : > { %v1007_v18 = vpop.f32.mrf.mxu0  ;;  %v1556_v19 = vpop.f32.mrf.mxu1 }
 0x56c   : > { %v1107_v20 = vpop.f32.mrf.mxu0  ;;  %v1148_v21 = vpop.f32.mrf.mxu1 }
 0x56d   : > { %v1154_v47 = vadd.f32 %v1107_v20, %v1049_v2  ;;  %v1156_v48 = vadd.f32 %v1148_v21, %v1051_v42 }
 0x56e   : > { %v1109_v22 = vpop.f32.mrf.mxu0  ;;  %v1561_v24 = vpop.f32.mrf.mxu1 }
 0x56f   : > { %v1155_v51 = vadd.f32 %v1109_v22, %v1050_v44 }
 0x570   : > { %v1111_v27 = vpop.f32.mrf.mxu0  ;;  %v1151_v28 = vpop.f32.mrf.mxu1 }
 0x572   : > { %v1112_v32 = vpop.f32.mrf.mxu0  ;;  %v1562_v33 = vpop.f32.mrf.mxu1 }
 0x574   : > { %v1212_v37 = vpop.f32.mrf.mxu0  ;;  %v1253_v38 = vpop.f32.mrf.mxu1 }
 0x575   : > { %v1259_v52 = vadd.f32 %v1212_v37, %v1154_v47  ;;  %v1261_v53 = vadd.f32 %v1253_v38, %v1156_v48 }
 0x576   : > { %v1214_v45 = vpop.f32.mrf.mxu0  ;;  %v1567_v46 = vpop.f32.mrf.mxu1 }
 0x577   : > { %v1260_v57 = vadd.f32 %v1214_v45, %v1155_v51 }
 0x578   : > { %v1216_v43 = vpop.f32.mrf.mxu0  ;;  %v1256_v23 = vpop.f32.mrf.mxu1 }
 0x57a   : > { %v1217_v49 = vpop.f32.mrf.mxu0  ;;  %v1568_v50 = vpop.f32.mrf.mxu1 }
 0x57c   : > { %v1317_v55 = vpop.f32.mrf.mxu0  ;;  %v1358_v56 = vpop.f32.mrf.mxu1 }
 0x57d   : > { %v1364_v58 = vadd.f32 %v1317_v55, %v1259_v52  ;;  %v1366_v59 = vadd.f32 %v1358_v56, %v1261_v53 }
 0x57e   : > { %v1319_v60 = vpop.f32.mrf.mxu0  ;;  %v1573_v61 = vpop.f32.mrf.mxu1 }
 0x57f   : > { %v1365_v62 = vadd.f32 %v1319_v60, %v1260_v57  ;;  %v1373_v63 = vadd.f32 %v1371_v54, %v1364_v58  ;;  %v1375_v0 = vadd.f32 %v1371_v54, %v1366_v59 }
 0x580   : > { %v1321_v3 = vpop.f32.mrf.mxu0  ;;  %v1361_v4 = vpop.f32.mrf.mxu1 }
 0x581   : > { %v1374_v5 = vadd.f32 %v1371_v54, %v1365_v62  ;;  %1376 = vst [vmem:[%s301_s22] sm:$0xff] %v1373_v63  ;;  %1379 = vst.msk [vmem:[%s301_s22 + $0x10] sm:$0xff] %vm1378_vm2, %v1375_v0 }
 0x582   : > { %v1322_v6 = vpop.f32.mrf.mxu0  ;;  %v1574_v7 = vpop.f32.mrf.mxu1 }
 0x583   : > { %1377 = vst [vmem:[%s301_s22 + $0x8] sm:$0xff] %v1374_v5 }
 0x584   : > { %1658 = dma.done.wait (%p1593_p4), [#allocation3], 16  }
 0x585   : > { %1660 = vsyncadd (%p1593_p4), [#allocation3], 4294967280 }
 0x586 PF: > { %s20_s27 = sadd.s32 1, %s1663_s27  }
 0x587   : > { %p17_p12 = scmp.ge.s32.totalorder %s20_s27, 4  }
 0x589   :  { %19 = sbr.rel (!%p17_p12) target bundleno = 1 (0x1), region = 91 }
 0x58e   :  { %1422 = vsyncpa [#allocation3], 1 }
 0x58f   :  { %1424 = vsyncpa [#allocation3 + $0x1], 1 }

</bundles_post_ra>
